<compile_context>
chip_gen: v7x
topology: tpu7x:2x2x1
jax: 0.10.0
libtpu: 0.0.40
codegen_flags: <defaults>
</compile_context>

<pallas_src>
import functools
import math

import jax
import jax.numpy as jnp
from jax.experimental import pallas as pl
from jax.experimental.pallas import tpu as pltpu


# 32 MiB scoped VMEM: safe on v5e/v6e (128 MiB phys) and v7x (64 MiB phys),
# comfortably above what the tile sizes below require (double-buffered).
_VMEM_LIMIT = 32 * 1024 * 1024


def _pick_tile(dim, preferred, align):
    """Largest tile <= preferred that divides `dim` and is a multiple of `align`.
    Falls back to the full dimension, which is always a legal block shape."""
    if dim <= preferred:
        return dim
    t = (preferred // align) * align
    while t >= align:
        if dim % t == 0:
            return t
        t -= align
    return dim


# ---------------- tiled linear (y = x @ W_t) ----------------

def _matmul_kernel(x_ref, w_ref, o_ref, acc_ref):
    @pl.when(pl.program_id(2) == 0)
    def _init():
        acc_ref[...] = jnp.zeros_like(acc_ref)

    acc_ref[...] += jnp.dot(x_ref[...], w_ref[...],
                            preferred_element_type=jnp.float32)

    @pl.when(pl.program_id(2) == pl.num_programs(2) - 1)
    def _store():
        o_ref[...] = acc_ref[...].astype(o_ref.dtype)


def linear(x, w_t, *, out_dtype=None, tm=512, tn=512, tk=1024):
    """y = x @ w_t, with w_t in (in_features, out_features) layout (nn.Linear
    weight.T). Inputs are expected to already be in their HBM storage dtype
    (bf16 on the hot path); no in-kernel casts, f32 VMEM accumulation."""
    M, K = x.shape
    K2, N = w_t.shape
    assert K == K2
    if out_dtype is None:
        out_dtype = x.dtype
    row_align = 16 if x.dtype == jnp.bfloat16 else 8
    tm = _pick_tile(M, tm, row_align)
    tn = _pick_tile(N, tn, 128)
    tk = _pick_tile(K, tk, 128)
    return pl.pallas_call(
        _matmul_kernel,
        out_shape=jax.ShapeDtypeStruct((M, N), out_dtype),
        grid=(M // tm, N // tn, K // tk),
        in_specs=[
            pl.BlockSpec((tm, tk), lambda i, j, k: (i, k)),
            pl.BlockSpec((tk, tn), lambda i, j, k: (k, j)),
        ],
        out_specs=pl.BlockSpec((tm, tn), lambda i, j, k: (i, j)),
        scratch_shapes=[pltpu.VMEM((tm, tn), jnp.float32)],
        compiler_params=pltpu.CompilerParams(
            dimension_semantics=("parallel", "parallel", "arbitrary"),
            vmem_limit_bytes=_VMEM_LIMIT),
    )(x, w_t)


# ---------------- flash attention + adapter-prompt epilogue ----------------

def _flash_adapter_kernel(q_ref, k_ref, v_ref, ak_ref, av_ref, gate_ref,
                          o_ref, m_scr, l_scr, acc_scr,
                          *, sm_scale, adapter_len):
    h = pl.program_id(1)
    qi = pl.program_id(2)
    ki = pl.program_id(3)

    @pl.when(ki == 0)
    def _init():
        m_scr[...] = jnp.full_like(m_scr, -jnp.inf)
        l_scr[...] = jnp.zeros_like(l_scr)
        acc_scr[...] = jnp.zeros_like(acc_scr)

    def _scaled_q():
        # fold sm_scale into the (tq, hs) q tile (cheaper than scaling (tq, tk)
        # scores every kv step)
        return q_ref[0, 0] * sm_scale

    def _online_update(q, apply_mask):
        k = k_ref[0, 0]          # (tk, hs)
        v = v_ref[0, 0]          # (tk, hs)
        # contract directly on head_size: no k.T relayout
        s = jax.lax.dot_general(q, k, (((1,), (1,)), ((), ())),
                                preferred_element_type=jnp.float32)
        if apply_mask:
            # diagonal block only (qi == ki, tq == tk) so the mask is local.
            # NOTE: -1e30 is safe because every row of the diagonal block has
            # at least its own diagonal element unmasked.
            tq, tk = s.shape
            row = jax.lax.broadcasted_iota(jnp.int32, (tq, 1), 0)
            col = jax.lax.broadcasted_iota(jnp.int32, (1, tk), 1)
            s = jnp.where(row >= col, s, -1e30)
        m_prev = m_scr[...]
        m_new = jnp.maximum(m_prev, jnp.max(s, axis=-1, keepdims=True))
        alpha = jnp.exp(m_prev - m_new)
        p = jnp.exp(s - m_new)
        l_scr[...] = alpha * l_scr[...] + jnp.sum(p, axis=-1, keepdims=True)
        acc_scr[...] = alpha * acc_scr[...] + jnp.dot(
            p.astype(v.dtype), v, preferred_element_type=jnp.float32)
        m_scr[...] = m_new

    # Off-diagonal causal blocks: fully unmasked (no iota/compare/where).
    @pl.when(ki < qi)
    def _off_diag():
        _online_update(_scaled_q(), apply_mask=False)

    # Diagonal block: masked update + finalize (adapter branch + writeback).
    # Steps with ki > qi do nothing at all (their K/V DMA is elided by the
    # clamped index_map in adapter_flash_attention).
    @pl.when(ki == qi)
    def _diag_and_finalize():
        q = _scaled_q()
        _online_update(q, apply_mask=True)

        # adapter-prompt attention (non-causal, separately normalized)
        ak = ak_ref[0]           # (aT_pad, hs), rows >= adapter_len zero-padded
        av = av_ref[0]
        sa = jax.lax.dot_general(q, ak, (((1,), (1,)), ((), ())),
                                 preferred_element_type=jnp.float32)
        acol = jax.lax.broadcasted_iota(jnp.int32, sa.shape, 1)
        sa = jnp.where(acol < adapter_len, sa, -1e30)
        sa = sa - jnp.max(sa, axis=-1, keepdims=True)
        pa = jnp.exp(sa)
        inv_la = pl.reciprocal(jnp.sum(pa, axis=-1, keepdims=True), approx=True)
        ya = jnp.dot(pa.astype(av.dtype), av,
                     preferred_element_type=jnp.float32) * inv_la

        inv_l = pl.reciprocal(l_scr[...], approx=True)
        g = gate_ref[h]          # scalar from SMEM
        o_ref[0, 0] = (acc_scr[...] * inv_l + g * ya).astype(o_ref.dtype)


def adapter_flash_attention(q, k, v, ak, av, gating, adapter_len, *,
                            tq=512, tk=512):
    """q,k,v: (B, nh, T, hs); ak,av: (nh, aT_pad, hs) zero-padded along axis 1;
    gating: (nh,) f32; adapter_len: true adapter prompt length."""
    B, nh, T, hs = q.shape
    aT_pad = ak.shape[1]
    row_align = 16 if q.dtype == jnp.bfloat16 else 8
    # tq == tk is required by the diagonal-block mask/finalize logic.
    t = _pick_tile(T, min(tq, tk), row_align)
    sm_scale = 1.0 / math.sqrt(hs)
    kernel = functools.partial(
        _flash_adapter_kernel, sm_scale=sm_scale, adapter_len=adapter_len)
    n_blk = T // t
    return pl.pallas_call(
        kernel,
        out_shape=jax.ShapeDtypeStruct((B, nh, T, hs), q.dtype),
        grid=(B, nh, n_blk, n_blk),
        in_specs=[
            pl.BlockSpec((1, 1, t, hs), lambda b, h, qi, ki: (b, h, qi, 0)),
            # clamp K/V block index to the diagonal: causally-skipped steps
            # return the same block index, so Pallas elides the re-DMA.
            pl.BlockSpec((1, 1, t, hs),
                         lambda b, h, qi, ki: (b, h, jnp.minimum(ki, qi), 0)),
            pl.BlockSpec((1, 1, t, hs),
                         lambda b, h, qi, ki: (b, h, jnp.minimum(ki, qi), 0)),
            pl.BlockSpec((1, aT_pad, hs), lambda b, h, qi, ki: (h, 0, 0)),
            pl.BlockSpec((1, aT_pad, hs), lambda b, h, qi, ki: (h, 0, 0)),
            pl.BlockSpec(memory_space=pltpu.MemorySpace.SMEM),
        ],
        out_specs=pl.BlockSpec((1, 1, t, hs), lambda b, h, qi, ki: (b, h, qi, 0)),
        scratch_shapes=[
            pltpu.VMEM((t, 1), jnp.float32),    # running max m
            pltpu.VMEM((t, 1), jnp.float32),    # running denom l
            pltpu.VMEM((t, hs), jnp.float32),   # output accumulator
        ],
        compiler_params=pltpu.CompilerParams(
            dimension_semantics=("parallel", "parallel", "parallel", "arbitrary"),
            vmem_limit_bytes=_VMEM_LIMIT),
    )(q, k, v, ak, av, gating)


# ---------------- JAX glue (RoPE cache / reshapes) ----------------

def build_rope_cache(T, n_elem, base=10000.0):
    theta = 1.0 / (base ** (jnp.arange(0, n_elem, 2, dtype=jnp.float32) / n_elem))
    seq = jnp.arange(T, dtype=jnp.float32)
    idx_theta = jnp.outer(seq, theta)            # (T, n_elem // 2)
    return jnp.cos(idx_theta), jnp.sin(idx_theta)


def apply_rope(x, cos, sin):
    # x: (B, T, nh, hs); interleaved-pair rotation identical to lit_llama.apply_rope.
    # Rotation computed in f32, result returned in x.dtype (bf16 on hot path).
    B, T, nh, hs = x.shape
    xs = x.astype(jnp.float32).reshape(B, T, nh, hs // 2, 2)
    c = cos[None, :, None, :]
    s = sin[None, :, None, :]
    o0 = xs[..., 0] * c - xs[..., 1] * s
    o1 = xs[..., 1] * c + xs[..., 0] * s
    return jnp.stack([o0, o1], axis=-1).reshape(B, T, nh, hs).astype(x.dtype)


def causal_self_attention(x, W_attn_t, W_proj_t, adapter_wte, gating, n_head):
    """Forward of the adapter CausalSelfAttention.
    W_attn_t: (C, 3C), W_proj_t: (C, C) -- pre-transposed nn.Linear weights,
    ideally already stored as bf16. Returns f32 (B, T, C)."""
    B, T, C = x.shape
    hs = C // n_head

    # hot-path storage dtype: bf16 (f32 accumulation happens inside kernels)
    x_bf = x.astype(jnp.bfloat16)
    W_attn_bf = W_attn_t.astype(jnp.bfloat16)
    W_proj_bf = W_proj_t.astype(jnp.bfloat16)
    awte_bf = adapter_wte.astype(jnp.bfloat16)

    # QKV projection: adapter rows concatenated onto x so W_attn is read once
    # for both (no second full-weight pass for ~10 adapter rows).
    aT = adapter_wte.shape[0]
    M_all = B * T + aT
    M_pad = ((M_all + 15) // 16) * 16
    x_all = jnp.concatenate([x_bf.reshape(B * T, C), awte_bf], axis=0)
    x_all = jnp.pad(x_all, ((0, M_pad - M_all), (0, 0)))
    qkv_all = linear(x_all, W_attn_bf, out_dtype=jnp.bfloat16)   # (M_pad, 3C)

    qkv = qkv_all[:B * T].reshape(B, T, 3 * C)
    aqkv = qkv_all[B * T:B * T + aT]                             # (aT, 3C)

    q, k, v = jnp.split(qkv, 3, axis=2)
    q = q.reshape(B, T, n_head, hs)
    k = k.reshape(B, T, n_head, hs)
    v = v.reshape(B, T, n_head, hs)

    cos, sin = build_rope_cache(T, hs)
    q = apply_rope(q, cos, sin)
    k = apply_rope(k, cos, sin)

    q = q.transpose(0, 2, 1, 3)   # (B, nh, T, hs)
    k = k.transpose(0, 2, 1, 3)
    v = v.transpose(0, 2, 1, 3)

    # TODO(synk): kv_cache / adapter_kv_cache incremental-decode paths are not
    # implemented (they are None in this forward, matching the default call).
    # TODO(synk): RoPE + head-split could be fused into the attention kernel's
    # q/k load path (BlockSpecs on the (B,T,3C) qkv array) when hs is a
    # multiple of 128, removing the remaining split/RoPE/transpose HBM round
    # trips; kept in JAX glue here so small head sizes stay legal.
    # TODO(synk): for hs=64 models on v6e/v7x, pack two heads per attention
    # block to fill the 256-wide MXU.

    # adapter prefix keys/values: shared across batch, NO RoPE (matches PyTorch)
    _, ak, av = jnp.split(aqkv, 3, axis=1)
    ak = ak.reshape(aT, n_head, hs).transpose(1, 0, 2)           # (nh, aT, hs)
    av = av.reshape(aT, n_head, hs).transpose(1, 0, 2)
    # pad adapter length to a lane-friendly multiple of 128; padded columns are
    # masked with -1e30 inside the kernel before the adapter softmax
    aT_pad = ((aT + 127) // 128) * 128
    ak = jnp.pad(ak, ((0, 0), (0, aT_pad - aT), (0, 0)))
    av = jnp.pad(av, ((0, 0), (0, aT_pad - aT), (0, 0)))

    gate = gating.reshape(-1).astype(jnp.float32)                # (nh,) -> SMEM

    y = adapter_flash_attention(q, k, v, ak, av, gate, aT)       # bf16 out

    y = y.transpose(0, 2, 1, 3).reshape(B * T, C)
    y = linear(y, W_proj_bf, out_dtype=jnp.float32).reshape(B, T, C)
    return y


# ---------------- pure-JAX reference (for sanity check) ----------------

def _reference_forward(x, W_attn_t, W_proj_t, adapter_wte, gating, n_head):
    B, T, C = x.shape
    hs = C // n_head
    qkv = (x.reshape(B * T, C) @ W_attn_t).reshape(B, T, 3 * C)
    q, k, v = jnp.split(qkv, 3, axis=2)
    q = q.reshape(B, T, n_head, hs)
    k = k.reshape(B, T, n_head, hs)
    v = v.reshape(B, T, n_head, hs)
    cos, sin = build_rope_cache(T, hs)
    q = apply_rope(q, cos, sin)
    k = apply_rope(k, cos, sin)
    q = q.transpose(0, 2, 1, 3)
    k = k.transpose(0, 2, 1, 3)
    v = v.transpose(0, 2, 1, 3)
    scale = 1.0 / math.sqrt(hs)
    s = jnp.einsum('bhqd,bhkd->bhqk', q, k) * scale
    mask = jnp.tril(jnp.ones((T, T), bool))
    s = jnp.where(mask, s, -jnp.inf)
    y = jnp.einsum('bhqk,bhkd->bhqd', jax.nn.softmax(s, axis=-1), v)

    aT = adapter_wte.shape[0]
    aqkv = adapter_wte @ W_attn_t
    _, ak, av = jnp.split(aqkv, 3, axis=1)
    ak = ak.reshape(aT, n_head, hs).transpose(1, 0, 2)
    av = av.reshape(aT, n_head, hs).transpose(1, 0, 2)
    sa = jnp.einsum('bhqd,hkd->bhqk', q, ak) * scale
    ya = jnp.einsum('bhqk,hkd->bhqd', jax.nn.softmax(sa, axis=-1), av)
    y = y + gating.reshape(1, n_head, 1, 1) * ya
    y = y.transpose(0, 2, 1, 3).reshape(B * T, C)
    return (y @ W_proj_t).reshape(B, T, C)


# ---------------- demo ----------------

if __name__ == "__main__":
    # small config consistent with the module
    B, T = 2, 8
    n_embd, n_head = 32, 4          # head_size = 8
    adapter_prompt_length = 10
    # block_idx (=2) >= adapter_start_layer (=2) -> adapter path is active

    key = jax.random.PRNGKey(0)
    k1, k2, k3, k4, k5 = jax.random.split(key, 5)

    x = jax.random.normal(k1, (B, T, n_embd), jnp.float32)
    # nn.Linear(n_embd, 3*n_embd, bias=False).weight -> (3C, C)
    W_attn = jax.random.normal(k2, (3 * n_embd, n_embd), jnp.float32) * 0.02
    # nn.Linear(n_embd, n_embd, bias=False).weight -> (C, C)
    W_proj = jax.random.normal(k3, (n_embd, n_embd), jnp.float32) * 0.02
    # nn.Embedding(adapter_prompt_length, n_embd).weight -> (aT, C)
    adapter_wte = jax.random.normal(k4, (adapter_prompt_length, n_embd), jnp.float32) * 0.02
    # gating_factor: PyTorch inits zeros(1, n_head, 1, 1); use small random values
    # so the adapter branch actually contributes to the output.
    gating = jax.random.normal(k5, (1, n_head, 1, 1), jnp.float32) * 0.1

    # weights pre-transposed once, outside the forward (nn.Linear semantics: x @ W^T)
    W_attn_t = W_attn.T
    W_proj_t = W_proj.T

    y = causal_self_attention(x, W_attn_t, W_proj_t, adapter_wte, gating, n_head)
    jax.block_until_ready(y)
    assert y.shape == (B, T, n_embd)

    # sanity check vs pure-JAX f32 reference (loose tolerance: bf16 storage /
    # MXU operands + approximate reciprocal in the kernel path)
    y_ref = _reference_forward(x, W_attn_t, W_proj_t, adapter_wte, gating, n_head)
    err = float(jnp.max(jnp.abs(y - y_ref)))
    assert err < 2e-2, f"max abs error vs reference too large: {err}"

    print("KERNEL_OK")
</pallas_src>

<mosaic_0001>
module attributes {stable_mosaic.version = 11 : i64} {
  func.func @_matmul_kernel(%arg0: i32, %arg1: i32, %arg2: i32, %arg3: memref<32x32xbf16, #tpu.memory_space<vmem>>, %arg4: memref<32x96xbf16, #tpu.memory_space<vmem>>, %arg5: memref<32x96xbf16, #tpu.memory_space<vmem>>, %arg6: memref<32x96xf32, #tpu.memory_space<vmem>>) attributes {dimension_semantics = [#tpu.dimension_semantics<parallel>, #tpu.dimension_semantics<parallel>, #tpu.dimension_semantics<arbitrary>], iteration_bounds = array<i64: 1, 1, 1>, scalar_prefetch = 0 : i64, scratch_operands = 1 : i64, tpu.core_type = #tpu.core_type<tc>, window_params = [{transform_indices = @transform_0, window_bounds = array<i64: 32, 32>}, {transform_indices = @transform_1, window_bounds = array<i64: 32, 96>}, {transform_indices = @transform_2, window_bounds = array<i64: 32, 96>}]} {
    %c0_i32 = arith.constant 0 : i32
    %0 = arith.cmpi eq, %arg2, %c0_i32 : i32
    %1 = arith.extui %0 : i1 to i32
    %c0_i32_0 = arith.constant 0 : i32
    %2 = arith.cmpi ne, %1, %c0_i32_0 : i32
    scf.if %2 {
      %cst_10 = arith.constant 0.000000e+00 : f32
      %12 = vector.broadcast %cst_10 : f32 to vector<32x96xf32>
      %c0_11 = arith.constant 0 : index
      %c0_12 = arith.constant 0 : index
      %13 = vector.load %arg6[%c0_11, %c0_12] : memref<32x96xf32, #tpu.memory_space<vmem>>, vector<32x96xf32>
      tpu.vector_store %arg6[%c0_11, %c0_12], %12 {strides = array<i32>} : memref<32x96xf32, #tpu.memory_space<vmem>>, vector<32x96xf32>,
    } else {
    }
    %c0 = arith.constant 0 : index
    %c0_1 = arith.constant 0 : index
    %3 = vector.load %arg6[%c0, %c0_1] : memref<32x96xf32, #tpu.memory_space<vmem>>, vector<32x96xf32>
    %c0_2 = arith.constant 0 : index
    %c0_3 = arith.constant 0 : index
    %4 = vector.load %arg3[%c0_2, %c0_3] : memref<32x32xbf16, #tpu.memory_space<vmem>>, vector<32x32xbf16>
    %c0_4 = arith.constant 0 : index
    %c0_5 = arith.constant 0 : index
    %5 = vector.load %arg4[%c0_4, %c0_5] : memref<32x96xbf16, #tpu.memory_space<vmem>>, vector<32x96xbf16>
    %cst = arith.constant dense<0.000000e+00> : vector<32x96xf32>
    %6 = tpu.matmul %4, %5, %cst {dimension_numbers = #tpu.dot_dimension_numbers<[1], [0], [0], [1], [0, 0, 1, 1], [], []>} : vector<32x32xbf16>, vector<32x96xbf16>, vector<32x96xf32> -> vector<32x96xf32>
    %7 = arith.addf %3, %6 : vector<32x96xf32>
    %c0_6 = arith.constant 0 : index
    %c0_7 = arith.constant 0 : index
    %8 = vector.load %arg6[%c0_6, %c0_7] : memref<32x96xf32, #tpu.memory_space<vmem>>, vector<32x96xf32>
    tpu.vector_store %arg6[%c0_6, %c0_7], %7 {strides = array<i32>} : memref<32x96xf32, #tpu.memory_space<vmem>>, vector<32x96xf32>,
    %c0_i32_8 = arith.constant 0 : i32
    %9 = arith.cmpi eq, %arg2, %c0_i32_8 : i32
    %10 = arith.extui %9 : i1 to i32
    %c0_i32_9 = arith.constant 0 : i32
    %11 = arith.cmpi ne, %10, %c0_i32_9 : i32
    scf.if %11 {
      %c0_10 = arith.constant 0 : index
      %c0_11 = arith.constant 0 : index
      %12 = vector.load %arg6[%c0_10, %c0_11] : memref<32x96xf32, #tpu.memory_space<vmem>>, vector<32x96xf32>
      %13 = arith.truncf %12 : vector<32x96xf32> to vector<32x96xbf16>
      %c0_12 = arith.constant 0 : index
      %c0_13 = arith.constant 0 : index
      %14 = vector.load %arg5[%c0_12, %c0_13] : memref<32x96xbf16, #tpu.memory_space<vmem>>, vector<32x96xbf16>
      tpu.vector_store %arg5[%c0_12, %c0_13], %13 {strides = array<i32>} : memref<32x96xbf16, #tpu.memory_space<vmem>>, vector<32x96xbf16>,
    } else {
    }
    return
  }
  func.func @transform_0(%arg0: i32, %arg1: i32, %arg2: i32) -> (i32, i32) {
    %c0_i32 = arith.constant 0 : i32
    return %arg0, %arg2 : i32, i32
  }
  func.func @transform_1(%arg0: i32, %arg1: i32, %arg2: i32) -> (i32, i32) {
    %c0_i32 = arith.constant 0 : i32
    return %arg2, %arg1 : i32, i32
  }
  func.func @transform_2(%arg0: i32, %arg1: i32, %arg2: i32) -> (i32, i32) {
    %c0_i32 = arith.constant 0 : i32
    return %arg0, %arg1 : i32, i32
  }
}

</mosaic_0001>

<bundles_post_ra>
// kernel: tpu_custom_call.1
= control target key start
LH: loop header
LB: loop body
LE: loop exit
PB: predicated region body
PF: predicated region fallthrough
CT: control target
= control target key end

     0   :  { %7 = vsyncpa [#allocation4], 0  ;;  %s377_s0 = inlined_call_operand.hbm [shape: bf16[32,32], index: 0, kind: input, shape index: {}]   ;;  %s378_s1 = inlined_call_operand.hbm [shape: bf16[32,96], index: 1, kind: input, shape index: {}]   ;;  %s379_s2 = inlined_call_operand.hbm [shape: bf16[32,96], index: 2, kind: output, shape index: {}]  }
   0x1   :  { %8 = vsyncpa [#allocation7], 0 }
   0x2   :  { %9 = vsyncpa [#allocation5], 0  ;;  %s303_s9 = smov [#allocation3]   ;;  %s231_s13 = scalar_lea.hbm %s377_s0, 256 }
   0x3   :  { %s15_s10 = sshll.u32 %s303_s9, 4  ;;  %p232_p0 = scmp.ne.s32.totalorder %s377_s0, %s231_s13  ;;  %s16_s10 = int_to_ptr.vmem [resolvable:$true] %s15_s10 }
   0x4   :  { %p235_p1 = scmp.lt.u32.totalorder %s231_s13, %s377_s0 }
   0x6   :  { %p237_p2 = pnand %p235_p1, %p232_p0 }
   0x8   :  { %240 = shalt.err (!%p237_p2)
}
   0x9   :  { %s241_s18 = scalar_lea.vmem %s16_s10, 256  ;;  %p246_p4 = scmp.lt.s32.totalorder %s16_s10, %s16_s10 }
   0xa   :  { %p242_p3 = scmp.ne.s32.totalorder %s16_s10, %s241_s18  ;;  %p247_p5 = scmp.lt.s32.totalorder %s241_s18, %s241_s18 }
   0xc   :  { %p248_p6 = por %p247_p5, %p246_p4 }
   0xe   :  { %p249_p7 = pnand %p248_p6, %p242_p3 }
  0x10   :  { %252 = shalt.err (!%p249_p7)
}
  0x11   :  { %s304_s19 = smov 64   ;;  %s305_s20 = smov 4  }
  0x12   :  { %21 = dma.hbm_to_vmem [thread:$0]  %s377_s0, 256, %s16_s10, [#allocation4], %s304_s19, %s304_s19, %s305_s20  }
  0x13   :  { %s306_s23 = smov [#allocation6]   ;;  %s253_s27 = scalar_lea.hbm %s378_s1, 256 }
  0x14   :  { %s27_s24 = sshll.u32 %s306_s23, 4  ;;  %p254_p8 = scmp.ne.s32.totalorder %s378_s1, %s253_s27  ;;  %s28_s24 = int_to_ptr.vmem [resolvable:$true] %s27_s24 }
  0x15   :  { %p257_p9 = scmp.lt.u32.totalorder %s253_s27, %s378_s1 }
  0x17   :  { %p259_p10 = pnand %p257_p9, %p254_p8 }
  0x19   :  { %262 = shalt.err (!%p259_p10)
}
  0x1a   :  { %s263_s4 = scalar_lea.vmem %s28_s24, 256  ;;  %p268_p12 = scmp.lt.s32.totalorder %s28_s24, %s28_s24 }
  0x1b   :  { %p264_p11 = scmp.ne.s32.totalorder %s28_s24, %s263_s4  ;;  %p269_p13 = scmp.lt.s32.totalorder %s263_s4, %s263_s4 }
  0x1d   :  { %p270_p0 = por %p269_p13, %p268_p12 }
  0x1f   :  { %p271_p1 = pnand %p270_p0, %p264_p11 }
  0x21   :  { %274 = shalt.err (!%p271_p1)
}
  0x22   :  { %33 = dma.hbm_to_vmem [thread:$0]  %s378_s1, 256, %s28_s24, [#allocation7], %s304_s19, %s304_s19, %s305_s20  }
  0x23   :  { %297 = dma.done.wait [#allocation4], 256  }
  0x24   :  { %298 = vsyncadd [#allocation4], 4294967040 }
  0x25   :  { %299 = dma.done.wait [#allocation7], 256  }
  0x26   :  { %300 = vsyncadd [#allocation7], 4294967040  ;;  %vm45_vm0 = vcmask 785408   ;;  %v307_v0 = vmov 0.0   ;;  %v227_v1 = vld [vmem:[#allocation6] sm:$0xff]   ;;  %v228_v2 = vld [vmem:[#allocation6 + $0x8] sm:$0xff]  }
  0x27   :  { %48 = vst.msk [vmem:[#allocation2 + $0x10] sm:$0xff] %vm45_vm0, %v307_v0  ;;  %46 = vst.msk [vmem:[#allocation2] sm:$0xff] %vm45_vm0, %v307_v0  ;;  %vm84_vm1 = vcmask 261120   ;;  %213 = vmatprep.subr.bf16.mxu0 %v227_v1  ;;  %v229_v3 = vld [vmem:[#allocation3] sm:$0xff]   ;;  %v230_v4 = vld [vmem:[#allocation3 + $0x8] sm:$0xff]   ;;  %vm172_vm2 = vcmask 781312  }
  0x28   :  { %47 = vst.msk [vmem:[#allocation2 + $0x8] sm:$0xff] %vm45_vm0, %v307_v0  ;;  %49 = vst.msk [vmem:[#allocation2 + $0x18] sm:$0xff] %vm45_vm0, %v307_v0  ;;  %214 = vmatpush3.bf16.msra.mxu0 %v227_v1  ;;  %217 = vmatprep.mubr.msk.bf16.mxu0 %vm84_vm1, %v229_v3  ;;  %s308_s1 = smov [#allocation8]  }
  0x29   :  { %215 = vmatprep.subr.bf16.mxu0 %v228_v2  ;;  %s182_s6 = sshll.u32 %s308_s1, 4  ;;  %s183_s6 = int_to_ptr.vmem [resolvable:$true] %s182_s6 }
  0x2a   :  { %s275_s7 = scalar_lea.vmem %s183_s6, 256  ;;  %p280_p3 = scmp.lt.s32.totalorder %s183_s6, %s183_s6 }
  0x2b   :  { %p276_p2 = scmp.ne.s32.totalorder %s183_s6, %s275_s7  ;;  %p281_p4 = scmp.lt.s32.totalorder %s275_s7, %s275_s7 }
  0x2c   :  { %216 = vmatpush3.bf16.msra.mxu0 %v228_v2 }
  0x2d   :  { %p282_p5 = por %p281_p4, %p280_p3 }
  0x2e   :  { %v52_v5 = vld [vmem:[#allocation2 + $0x10] sm:$0xff]  ;;  %v50_v6 = vld [vmem:[#allocation2] sm:$0xff] }
  0x2f   :  { %218 = vmatmul.mubr.msk.bf16.vlgmr.msra.gmra.mrb[0].mxu0 %vm84_vm1, %v230_v4  ;;  %v53_v8 = vld [vmem:[#allocation2 + $0x18] sm:$0xff]  ;;  %v51_v11 = vld [vmem:[#allocation2 + $0x8] sm:$0xff]  ;;  %p283_p6 = pnand %p282_p5, %p276_p2 }
 0x102   :  { %v219_v7 = vpop.f32.mrb[0].mxu0 }
 0x103   :  { %v142_v9 = vadd.f32 %v219_v7, %v52_v5  ;;  %v125_v10 = vpop.f32.mrb[1].mxu0 }
 0x104   :  { %v140_v12 = vadd.f32 %v125_v10, %v50_v6  ;;  %v220_v13 = vpop.f32.mrb[2].mxu0 }
 0x105   :  { %147 = vst.msk [vmem:[#allocation2 + $0x10] sm:$0xff] %vm45_vm0, %v142_v9  ;;  %v143_v14 = vadd.f32 %v220_v13, %v53_v8  ;;  %v128_v15 = vpop.f32.mrb[3].mxu0 }
 0x106   :  { %145 = vst.msk [vmem:[#allocation2] sm:$0xff] %vm45_vm0, %v140_v12  ;;  %v141_v16 = vadd.f32 %v128_v15, %v51_v11 }
 0x107   :  { %148 = vst.msk [vmem:[#allocation2 + $0x18] sm:$0xff] %vm45_vm0, %v143_v14 }
 0x108   :  { %146 = vst.msk [vmem:[#allocation2 + $0x8] sm:$0xff] %vm45_vm0, %v141_v16 }
 0x10c   :  { %v154_v17 = vld [vmem:[#allocation2 + $0x10] sm:$0xff] }
 0x10d   :  { %v152_v18 = vld [vmem:[#allocation2] sm:$0xff]  ;;  %v207_v19 = vpack.c.bf16 %v154_v17, %v154_v17 }
 0x10e   :  { %v155_v20 = vld [vmem:[#allocation2 + $0x18] sm:$0xff]  ;;  %v205_v21 = vpack.c.bf16 %v152_v18, %v152_v18 }
 0x10f   :  { %v153_v22 = vld [vmem:[#allocation2 + $0x8] sm:$0xff]  ;;  %v208_v23 = vpack.c.bf16 %v155_v20, %v155_v20  ;;  %175 = vst.msk [vmem:[#allocation8 + $0x8] sm:$0xf] %vm172_vm2, %v207_v19 }
 0x110   :  { %v206_v24 = vpack.c.bf16 %v153_v22, %v153_v22  ;;  %173 = vst.msk [vmem:[#allocation8] sm:$0xf] %vm172_vm2, %v205_v21 }
 0x111   :  { %176 = vst.msk [vmem:[#allocation8 + $0xc] sm:$0xf] %vm172_vm2, %v208_v23 }
 0x112   :  { %174 = vst.msk [vmem:[#allocation8 + $0x4] sm:$0xf] %vm172_vm2, %v206_v24 }
 0x113   :  { %286 = shalt.err (!%p283_p6)
}
 0x114   :  { %s287_s10 = scalar_lea.hbm %s379_s2, 256 }
 0x115   :  { %p288_p7 = scmp.ne.s32.totalorder %s379_s2, %s287_s10  ;;  %p291_p8 = scmp.lt.u32.totalorder %s287_s10, %s379_s2 }
 0x117   :  { %p293_p9 = pnand %p291_p8, %p288_p7 }
 0x119   :  { %296 = shalt.err (!%p293_p9)
}
 0x11a   :  { %188 = dma.vmem_to_hbm [thread:$0]  %s183_s6, 256, %s379_s2, [#allocation5], %s304_s19, %s304_s19, %s305_s20  }
 0x11b   :  { %301 = dma.done.wait [#allocation5], 256  }
 0x11c   :  { %302 = vsyncadd [#allocation5], 4294967040 }
 0x11d   :  { %192 = vsyncpa [#allocation4], 1 }
 0x11e   :  { %193 = vsyncpa [#allocation7], 1 }
 0x11f   :  { %194 = vsyncpa [#allocation5], 1 }

</bundles_post_ra>
